<compile_context>
chip_gen: v5e
topology: v5e:2x2
jax: 0.10.0
libtpu: 0.0.40
codegen_flags: <defaults>
</compile_context>

<pallas_src>
import functools
import math

import jax
import jax.numpy as jnp
import numpy as np
from jax.experimental import pallas as pl
from jax.experimental.pallas import tpu as pltpu


def _round_up(x, m):
    return ((x + m - 1) // m) * m


def _cdiv(a, b):
    return (a + b - 1) // b


def flow_forward_kernel(fb_ref, wu_ref,                       # scalar-prefetch (SMEM)
                        s_ref, eps_ref,
                        w1_ref, b1_ref, w2_ref, b2_ref,
                        wh_ref, bh_ref,
                        fu_ref, fw_ref,
                        out_ref,
                        *, num_flows, p, out_lanes):
    f32 = jnp.float32
    bf16 = jnp.bfloat16

    # ---- MLP: Linear -> Tanh -> Linear -> Tanh (bf16 MXU ops, f32 accumulate) ----
    h = jnp.tanh(
        jnp.dot(s_ref[...].astype(bf16), w1_ref[...], preferred_element_type=f32)
        + b1_ref[...])
    h = jnp.tanh(
        jnp.dot(h.astype(bf16), w2_ref[...], preferred_element_type=f32)
        + b2_ref[...])

    # ---- fused heads: single (h2, 2P) matmul, sliced into mu / log_sigma ----
    head = (jnp.dot(h.astype(bf16), wh_ref[...], preferred_element_type=f32)
            + bh_ref[...])
    mu = head[:, :p]                                          # (TB, P)
    log_sigma = head[:, p:]                                   # (TB, P)

    # ---- reparameterized sample ----
    eps = eps_ref[...]                                        # (TB, P) f32
    z0 = mu + jnp.exp(log_sigma) * eps

    # ---- base Gaussian log prob: ((z0 - mu) / sigma)^2 == eps^2 ----
    log2pi = jnp.float32(math.log(2.0 * math.pi))
    log_prob_z0 = -0.5 * (
        jnp.sum(eps * eps + 2.0 * log_sigma, axis=1, keepdims=True)
        + jnp.float32(p) * log2pi)                            # (TB, 1)

    # ---- planar flow chain (statically unrolled); product-then-single-log ----
    zk = z0
    det_prod = jnp.ones_like(log_prob_z0)
    for i in range(num_flows):
        u_i = fu_ref[i:i + 1, :]                              # (1, P)
        w_i = fw_ref[i:i + 1, :]                              # (1, P)
        b_i = fb_ref[i]                                       # SMEM scalar
        wu_i = wu_ref[i]                                      # SMEM scalar (w_i . u_i)
        lin = jnp.sum(zk * w_i, axis=1, keepdims=True) + b_i  # (TB, 1)
        t = jnp.tanh(lin)
        zk = zk + u_i * t                                     # (TB, P)
        # sum(psi * u) == (1 - t^2) * (w . u): no per-flow cross-lane reduce
        det_prod = det_prod * (jnp.abs(1.0 + (1.0 - t * t) * wu_i) + 1e-8)

    log_q = log_prob_z0 - jnp.log(det_prod)                   # (TB, 1)

    # ---- single packed output slab: zk | mu | log_sigma | log_q (+ padding) ----
    tb = zk.shape[0]
    out_ref[:, 0 * p:1 * p] = zk
    out_ref[:, 1 * p:2 * p] = mu
    out_ref[:, 2 * p:3 * p] = log_sigma
    out_ref[:, 3 * p:] = jnp.broadcast_to(log_q, (tb, out_lanes - 3 * p))


def prepare_params(params):
    """One-time parameter prep (fusion / casts / w·u).  Cache the result across calls."""
    f32, bf16 = jnp.float32, jnp.bfloat16
    num_flows = params["fu"].shape[0]
    return {
        "w1": params["w1"].astype(bf16),
        "b1": params["b1"].astype(f32),
        "w2": params["w2"].astype(bf16),
        "b2": params["b2"].astype(f32),
        # fused mu | log_sigma head
        "wh": jnp.concatenate([params["wmu"], params["wls"]], axis=1).astype(bf16),
        "bh": jnp.concatenate([params["bmu"], params["bls"]], axis=1).astype(f32),
        "fu": params["fu"].astype(f32),
        "fw": params["fw"].astype(f32),
        "fb": params["fb"].reshape(num_flows).astype(f32),
        "wu": jnp.sum(params["fw"] * params["fu"], axis=1).astype(f32),   # w·u per flow
    }


def flow_forward(S, eps, params):
    """FlowForwardModel forward pass in one Pallas kernel.

    `params` may be the raw dict (see init_params) or a prepare_params() result.
    Returns (zk, log_q, mu, log_sigma) with shapes (B,P), (B,), (B,P), (B,P).
    """
    if "wh" not in params:
        params = prepare_params(params)

    B, S_dim = S.shape
    num_flows, P = params["fu"].shape
    h1 = params["w1"].shape[1]
    h2 = params["w2"].shape[1]

    f32 = jnp.float32
    LANE = 128
    OUT_LANES = _round_up(3 * P + 1, LANE)        # zk | mu | log_sigma | log_q (+pad)

    # batch tiling: >= 2 and even block count so both v7x TensorCores get work;
    # TB capped near 1024 rows (live VMEM per step stays ~1-2 MiB on every gen).
    TB_MAX = 1024
    B8 = _round_up(B, 8)
    nb = max(2, _cdiv(B8, TB_MAX))
    nb += nb % 2
    TB = _round_up(_cdiv(B8, nb), 8)
    B_pad = TB * nb
    num_blocks = nb

    S_p = S.astype(f32)
    eps_p = eps.astype(f32)
    if B_pad != B:                                # row padding only (no lane padding)
        S_p = jnp.pad(S_p, ((0, B_pad - B), (0, 0)))
        eps_p = jnp.pad(eps_p, ((0, B_pad - B), (0, 0)))

    kernel = functools.partial(flow_forward_kernel,
                               num_flows=num_flows, p=P, out_lanes=OUT_LANES)

    grid_spec = pltpu.PrefetchScalarGridSpec(
        num_scalar_prefetch=2,                    # fb, wu -> SMEM scalars
        grid=(num_blocks,),
        in_specs=[
            pl.BlockSpec((TB, S_dim), lambda i, *_: (i, 0)),           # S (native width)
            pl.BlockSpec((TB, P), lambda i, *_: (i, 0)),               # eps (native width)
            pl.BlockSpec((S_dim, h1), lambda i, *_: (0, 0)),           # w1 (bf16)
            pl.BlockSpec((1, h1), lambda i, *_: (0, 0)),               # b1
            pl.BlockSpec((h1, h2), lambda i, *_: (0, 0)),              # w2 (bf16)
            pl.BlockSpec((1, h2), lambda i, *_: (0, 0)),               # b2
            pl.BlockSpec((h2, 2 * P), lambda i, *_: (0, 0)),           # fused head W (bf16)
            pl.BlockSpec((1, 2 * P), lambda i, *_: (0, 0)),            # fused head b
            pl.BlockSpec((num_flows, P), lambda i, *_: (0, 0)),        # fu
            pl.BlockSpec((num_flows, P), lambda i, *_: (0, 0)),        # fw
        ],
        out_specs=pl.BlockSpec((TB, OUT_LANES), lambda i, *_: (i, 0)),
    )

    out = pl.pallas_call(
        kernel,
        out_shape=jax.ShapeDtypeStruct((B_pad, OUT_LANES), f32),
        grid_spec=grid_spec,
        compiler_params=pltpu.CompilerParams(
            dimension_semantics=("parallel",)),
    )(params["fb"], params["wu"], S_p, eps_p,
      params["w1"], params["b1"], params["w2"], params["b2"],
      params["wh"], params["bh"], params["fu"], params["fw"])

    zk = out[:B, 0 * P:1 * P]
    mu = out[:B, 1 * P:2 * P]
    log_sigma = out[:B, 2 * P:3 * P]
    log_q = out[:B, 3 * P]
    return zk, log_q, mu, log_sigma


def flow_forward_ref(S, eps, params, *, num_flows):
    """Pure-JAX reference mirroring the PyTorch module (given eps)."""
    h = jnp.tanh(S @ params["w1"] + params["b1"])
    h = jnp.tanh(h @ params["w2"] + params["b2"])
    mu = h @ params["wmu"] + params["bmu"]
    log_sigma = h @ params["wls"] + params["bls"]
    sigma = jnp.exp(log_sigma)
    z0 = mu + sigma * eps
    log_prob_z0 = -0.5 * jnp.sum(
        ((z0 - mu) / sigma) ** 2 + 2.0 * log_sigma + math.log(2.0 * math.pi), axis=1)
    zk = z0
    log_det_sum = jnp.zeros((S.shape[0],), jnp.float32)
    for i in range(num_flows):
        u_i = params["fu"][i][None, :]
        w_i = params["fw"][i][None, :]
        b_i = params["fb"][i, 0]
        lin = jnp.sum(zk * w_i, axis=1) + b_i
        t = jnp.tanh(lin)
        zk = zk + u_i * t[:, None]
        psi = (1.0 - t[:, None] ** 2) * w_i
        wu = jnp.sum(psi * u_i, axis=1)
        log_det_sum = log_det_sum + jnp.log(jnp.abs(1.0 + wu) + 1e-8)
    log_q = log_prob_z0 - log_det_sum
    return zk, log_q, mu, log_sigma


def init_params(key, S_dim, hidden_dims, P_dim, num_flows):
    """Deterministic synthetic parameter init (stands in for nn.Linear init)."""
    ks = list(jax.random.split(key, 16))
    scale = 0.1
    h1, h2 = hidden_dims
    return {
        "w1":  scale * jax.random.normal(ks[0], (S_dim, h1), jnp.float32),
        "b1":  scale * jax.random.normal(ks[1], (1, h1), jnp.float32),
        "w2":  scale * jax.random.normal(ks[2], (h1, h2), jnp.float32),
        "b2":  scale * jax.random.normal(ks[3], (1, h2), jnp.float32),
        "wmu": scale * jax.random.normal(ks[4], (h2, P_dim), jnp.float32),
        "bmu": scale * jax.random.normal(ks[5], (1, P_dim), jnp.float32),
        "wls": scale * jax.random.normal(ks[6], (h2, P_dim), jnp.float32),
        "bls": scale * jax.random.normal(ks[7], (1, P_dim), jnp.float32),
        "fu":  scale * jax.random.normal(ks[8], (num_flows, P_dim), jnp.float32),
        "fw":  scale * jax.random.normal(ks[9], (num_flows, P_dim), jnp.float32),
        "fb":  scale * jax.random.normal(ks[10], (num_flows, 1), jnp.float32),
    }


if __name__ == "__main__":
    B, S_dim, P_dim = 16, 8, 8
    hidden_dims = (32, 32)
    num_flows = 4

    key = jax.random.PRNGKey(0)
    k_params, k_S, k_eps = jax.random.split(key, 3)

    params = init_params(k_params, S_dim, hidden_dims, P_dim, num_flows)
    S = jax.random.normal(k_S, (B, S_dim), jnp.float32)
    eps = jax.random.normal(k_eps, (B, P_dim), jnp.float32)   # torch.randn_like(mu)

    prepared = prepare_params(params)                         # hoisted / cacheable
    zk, log_q, mu, log_sigma = flow_forward(S, eps, prepared)
    jax.block_until_ready((zk, log_q, mu, log_sigma))

    assert zk.shape == (B, P_dim)
    assert log_q.shape == (B,)
    assert mu.shape == (B, P_dim)
    assert log_sigma.shape == (B, P_dim)

    # correctness vs pure-JAX f32 reference (loose tol: bf16 MXU operands)
    zk_r, log_q_r, mu_r, ls_r = flow_forward_ref(S, eps, params, num_flows=num_flows)
    for got, ref in ((zk, zk_r), (log_q, log_q_r), (mu, mu_r), (log_sigma, ls_r)):
        np.testing.assert_allclose(np.asarray(got), np.asarray(ref),
                                   rtol=5e-2, atol=5e-2)

    print("KERNEL_OK")
</pallas_src>

<mosaic_0001>
module attributes {stable_mosaic.version = 11 : i64} {
  func.func @flow_forward_kernel(%arg0: i32, %arg1: memref<4xf32, #tpu.memory_space<smem>>, %arg2: memref<4xf32, #tpu.memory_space<smem>>, %arg3: memref<8x8xf32, #tpu.memory_space<vmem>>, %arg4: memref<8x8xf32, #tpu.memory_space<vmem>>, %arg5: memref<8x32xbf16, #tpu.memory_space<vmem>>, %arg6: memref<1x32xf32, #tpu.memory_space<vmem>>, %arg7: memref<32x32xbf16, #tpu.memory_space<vmem>>, %arg8: memref<1x32xf32, #tpu.memory_space<vmem>>, %arg9: memref<32x16xbf16, #tpu.memory_space<vmem>>, %arg10: memref<1x16xf32, #tpu.memory_space<vmem>>, %arg11: memref<4x8xf32, #tpu.memory_space<vmem>>, %arg12: memref<4x8xf32, #tpu.memory_space<vmem>>, %arg13: memref<8x128xf32, #tpu.memory_space<vmem>>) attributes {dimension_semantics = [#tpu.dimension_semantics<parallel>], iteration_bounds = array<i64: 2>, scalar_prefetch = 2 : i64, scratch_operands = 0 : i64, tpu.core_type = #tpu.core_type<tc>, window_params = [{transform_indices = @transform_0, window_bounds = array<i64: 8, 8>}, {transform_indices = @transform_1, window_bounds = array<i64: 8, 8>}, {pipeline_mode = #tpu.pipeline_mode<synchronous>, transform_indices = @transform_2, window_bounds = array<i64: 8, 32>}, {pipeline_mode = #tpu.pipeline_mode<synchronous>, transform_indices = @transform_3, window_bounds = array<i64: 1, 32>}, {pipeline_mode = #tpu.pipeline_mode<synchronous>, transform_indices = @transform_4, window_bounds = array<i64: 32, 32>}, {pipeline_mode = #tpu.pipeline_mode<synchronous>, transform_indices = @transform_5, window_bounds = array<i64: 1, 32>}, {pipeline_mode = #tpu.pipeline_mode<synchronous>, transform_indices = @transform_6, window_bounds = array<i64: 32, 16>}, {pipeline_mode = #tpu.pipeline_mode<synchronous>, transform_indices = @transform_7, window_bounds = array<i64: 1, 16>}, {pipeline_mode = #tpu.pipeline_mode<synchronous>, transform_indices = @transform_8, window_bounds = array<i64: 4, 8>}, {pipeline_mode = #tpu.pipeline_mode<synchronous>, transform_indices = @transform_9, window_bounds = array<i64: 4, 8>}, {transform_indices = @transform_10, window_bounds = array<i64: 8, 128>}]} {
    %c0 = arith.constant 0 : index
    %c0_0 = arith.constant 0 : index
    %0 = vector.load %arg3[%c0, %c0_0] : memref<8x8xf32, #tpu.memory_space<vmem>>, vector<8x8xf32>
    %1 = arith.truncf %0 : vector<8x8xf32> to vector<8x8xbf16>
    %c0_1 = arith.constant 0 : index
    %c0_2 = arith.constant 0 : index
    %2 = vector.load %arg5[%c0_1, %c0_2] : memref<8x32xbf16, #tpu.memory_space<vmem>>, vector<8x32xbf16>
    %cst = arith.constant dense<0.000000e+00> : vector<8x32xf32>
    %3 = tpu.matmul %1, %2, %cst {dimension_numbers = #tpu.dot_dimension_numbers<[1], [0], [0], [1], [0, 0, 1, 1], [], []>} : vector<8x8xbf16>, vector<8x32xbf16>, vector<8x32xf32> -> vector<8x32xf32>
    %c0_3 = arith.constant 0 : index
    %c0_4 = arith.constant 0 : index
    %4 = vector.load %arg6[%c0_3, %c0_4] : memref<1x32xf32, #tpu.memory_space<vmem>>, vector<1x32xf32>
    %5 = vector.broadcast %4 : vector<1x32xf32> to vector<8x32xf32>
    %6 = arith.addf %3, %5 : vector<8x32xf32>
    %7 = math.tanh %6 : vector<8x32xf32>
    %8 = arith.truncf %7 : vector<8x32xf32> to vector<8x32xbf16>
    %c0_5 = arith.constant 0 : index
    %c0_6 = arith.constant 0 : index
    %9 = vector.load %arg7[%c0_5, %c0_6] : memref<32x32xbf16, #tpu.memory_space<vmem>>, vector<32x32xbf16>
    %cst_7 = arith.constant dense<0.000000e+00> : vector<8x32xf32>
    %10 = tpu.matmul %8, %9, %cst_7 {dimension_numbers = #tpu.dot_dimension_numbers<[1], [0], [0], [1], [0, 0, 1, 1], [], []>} : vector<8x32xbf16>, vector<32x32xbf16>, vector<8x32xf32> -> vector<8x32xf32>
    %c0_8 = arith.constant 0 : index
    %c0_9 = arith.constant 0 : index
    %11 = vector.load %arg8[%c0_8, %c0_9] : memref<1x32xf32, #tpu.memory_space<vmem>>, vector<1x32xf32>
    %12 = vector.broadcast %11 : vector<1x32xf32> to vector<8x32xf32>
    %13 = arith.addf %10, %12 : vector<8x32xf32>
    %14 = math.tanh %13 : vector<8x32xf32>
    %15 = arith.truncf %14 : vector<8x32xf32> to vector<8x32xbf16>
    %c0_10 = arith.constant 0 : index
    %c0_11 = arith.constant 0 : index
    %16 = vector.load %arg9[%c0_10, %c0_11] : memref<32x16xbf16, #tpu.memory_space<vmem>>, vector<32x16xbf16>
    %cst_12 = arith.constant dense<0.000000e+00> : vector<8x16xf32>
    %17 = tpu.matmul %15, %16, %cst_12 {dimension_numbers = #tpu.dot_dimension_numbers<[1], [0], [0], [1], [0, 0, 1, 1], [], []>} : vector<8x32xbf16>, vector<32x16xbf16>, vector<8x16xf32> -> vector<8x16xf32>
    %c0_13 = arith.constant 0 : index
    %c0_14 = arith.constant 0 : index
    %18 = vector.load %arg10[%c0_13, %c0_14] : memref<1x16xf32, #tpu.memory_space<vmem>>, vector<1x16xf32>
    %19 = vector.broadcast %18 : vector<1x16xf32> to vector<8x16xf32>
    %20 = arith.addf %17, %19 : vector<8x16xf32>
    %21 = vector.extract_strided_slice %20 {offsets = [0, 0], sizes = [8, 8], strides = [1, 1]} : vector<8x16xf32> to vector<8x8xf32>
    %22 = vector.extract_strided_slice %20 {offsets = [0, 8], sizes = [8, 8], strides = [1, 1]} : vector<8x16xf32> to vector<8x8xf32>
    %c0_15 = arith.constant 0 : index
    %c0_16 = arith.constant 0 : index
    %23 = vector.load %arg4[%c0_15, %c0_16] : memref<8x8xf32, #tpu.memory_space<vmem>>, vector<8x8xf32>
    %24 = math.exp %22 : vector<8x8xf32>
    %25 = arith.mulf %24, %23 : vector<8x8xf32>
    %26 = arith.addf %21, %25 : vector<8x8xf32>
    %27 = arith.mulf %23, %23 : vector<8x8xf32>
    %cst_17 = arith.constant 2.000000e+00 : f32
    %28 = vector.broadcast %cst_17 : f32 to vector<8x8xf32>
    %29 = arith.mulf %28, %22 : vector<8x8xf32>
    %30 = arith.addf %27, %29 : vector<8x8xf32>
    %cst_18 = arith.constant dense<0.000000e+00> : vector<8xf32>
    %31 = vector.multi_reduction <add>, %30, %cst_18 [1] : vector<8x8xf32> to vector<8xf32>
    %32 = vector.shape_cast %31 : vector<8xf32> to vector<8x1xf32>
    %cst_19 = arith.constant 8.000000e+00 : f32
    %cst_20 = arith.constant 1.83787704 : f32
    %33 = arith.mulf %cst_19, %cst_20 : f32
    %34 = vector.broadcast %33 : f32 to vector<8x1xf32>
    %35 = arith.addf %32, %34 : vector<8x1xf32>
    %cst_21 = arith.constant -5.000000e-01 : f32
    %36 = vector.broadcast %cst_21 : f32 to vector<8x1xf32>
    %37 = arith.mulf %36, %35 : vector<8x1xf32>
    %cst_22 = arith.constant 1.000000e+00 : f32
    %38 = vector.broadcast %cst_22 : f32 to vector<8x1xf32>
    %c0_23 = arith.constant 0 : index
    %c0_24 = arith.constant 0 : index
    %39 = vector.load %arg11[%c0_23, %c0_24] : memref<4x8xf32, #tpu.memory_space<vmem>>, vector<1x8xf32>
    %c0_25 = arith.constant 0 : index
    %c0_26 = arith.constant 0 : index
    %40 = vector.load %arg12[%c0_25, %c0_26] : memref<4x8xf32, #tpu.memory_space<vmem>>, vector<1x8xf32>
    %c0_27 = arith.constant 0 : index
    %41 = memref.load %arg1[%c0_27] : memref<4xf32, #tpu.memory_space<smem>>
    %c0_28 = arith.constant 0 : index
    %42 = memref.load %arg2[%c0_28] : memref<4xf32, #tpu.memory_space<smem>>
    %43 = vector.broadcast %40 : vector<1x8xf32> to vector<8x8xf32>
    %44 = arith.mulf %26, %43 : vector<8x8xf32>
    %cst_29 = arith.constant dense<0.000000e+00> : vector<8xf32>
    %45 = vector.multi_reduction <add>, %44, %cst_29 [1] : vector<8x8xf32> to vector<8xf32>
    %46 = vector.shape_cast %45 : vector<8xf32> to vector<8x1xf32>
    %47 = vector.broadcast %41 : f32 to vector<8x1xf32>
    %48 = arith.addf %46, %47 : vector<8x1xf32>
    %49 = math.tanh %48 : vector<8x1xf32>
    %50 = vector.broadcast %39 : vector<1x8xf32> to vector<8x8xf32>
    %51 = vector.broadcast %49 : vector<8x1xf32> to vector<8x8xf32>
    %52 = arith.mulf %50, %51 : vector<8x8xf32>
    %53 = arith.addf %26, %52 : vector<8x8xf32>
    %54 = arith.mulf %49, %49 : vector<8x1xf32>
    %cst_30 = arith.constant 1.000000e+00 : f32
    %55 = vector.broadcast %cst_30 : f32 to vector<8x1xf32>
    %56 = arith.subf %55, %54 : vector<8x1xf32>
    %57 = vector.broadcast %42 : f32 to vector<8x1xf32>
    %58 = arith.mulf %56, %57 : vector<8x1xf32>
    %cst_31 = arith.constant 1.000000e+00 : f32
    %59 = vector.broadcast %cst_31 : f32 to vector<8x1xf32>
    %60 = arith.addf %59, %58 : vector<8x1xf32>
    %61 = math.absf %60 : vector<8x1xf32>
    %cst_32 = arith.constant 9.99999993E-9 : f32
    %62 = vector.broadcast %cst_32 : f32 to vector<8x1xf32>
    %63 = arith.addf %61, %62 : vector<8x1xf32>
    %64 = arith.mulf %38, %63 : vector<8x1xf32>
    %c1 = arith.constant 1 : index
    %c0_33 = arith.constant 0 : index
    %65 = vector.load %arg11[%c1, %c0_33] : memref<4x8xf32, #tpu.memory_space<vmem>>, vector<1x8xf32>
    %c1_34 = arith.constant 1 : index
    %c0_35 = arith.constant 0 : index
    %66 = vector.load %arg12[%c1_34, %c0_35] : memref<4x8xf32, #tpu.memory_space<vmem>>, vector<1x8xf32>
    %c1_36 = arith.constant 1 : index
    %67 = memref.load %arg1[%c1_36] : memref<4xf32, #tpu.memory_space<smem>>
    %c1_37 = arith.constant 1 : index
    %68 = memref.load %arg2[%c1_37] : memref<4xf32, #tpu.memory_space<smem>>
    %69 = vector.broadcast %66 : vector<1x8xf32> to vector<8x8xf32>
    %70 = arith.mulf %53, %69 : vector<8x8xf32>
    %cst_38 = arith.constant dense<0.000000e+00> : vector<8xf32>
    %71 = vector.multi_reduction <add>, %70, %cst_38 [1] : vector<8x8xf32> to vector<8xf32>
    %72 = vector.shape_cast %71 : vector<8xf32> to vector<8x1xf32>
    %73 = vector.broadcast %67 : f32 to vector<8x1xf32>
    %74 = arith.addf %72, %73 : vector<8x1xf32>
    %75 = math.tanh %74 : vector<8x1xf32>
    %76 = vector.broadcast %65 : vector<1x8xf32> to vector<8x8xf32>
    %77 = vector.broadcast %75 : vector<8x1xf32> to vector<8x8xf32>
    %78 = arith.mulf %76, %77 : vector<8x8xf32>
    %79 = arith.addf %53, %78 : vector<8x8xf32>
    %80 = arith.mulf %75, %75 : vector<8x1xf32>
    %cst_39 = arith.constant 1.000000e+00 : f32
    %81 = vector.broadcast %cst_39 : f32 to vector<8x1xf32>
    %82 = arith.subf %81, %80 : vector<8x1xf32>
    %83 = vector.broadcast %68 : f32 to vector<8x1xf32>
    %84 = arith.mulf %82, %83 : vector<8x1xf32>
    %cst_40 = arith.constant 1.000000e+00 : f32
    %85 = vector.broadcast %cst_40 : f32 to vector<8x1xf32>
    %86 = arith.addf %85, %84 : vector<8x1xf32>
    %87 = math.absf %86 : vector<8x1xf32>
    %cst_41 = arith.constant 9.99999993E-9 : f32
    %88 = vector.broadcast %cst_41 : f32 to vector<8x1xf32>
    %89 = arith.addf %87, %88 : vector<8x1xf32>
    %90 = arith.mulf %64, %89 : vector<8x1xf32>
    %c2 = arith.constant 2 : index
    %c0_42 = arith.constant 0 : index
    %91 = vector.load %arg11[%c2, %c0_42] : memref<4x8xf32, #tpu.memory_space<vmem>>, vector<1x8xf32>
    %c2_43 = arith.constant 2 : index
    %c0_44 = arith.constant 0 : index
    %92 = vector.load %arg12[%c2_43, %c0_44] : memref<4x8xf32, #tpu.memory_space<vmem>>, vector<1x8xf32>
    %c2_45 = arith.constant 2 : index
    %93 = memref.load %arg1[%c2_45] : memref<4xf32, #tpu.memory_space<smem>>
    %c2_46 = arith.constant 2 : index
    %94 = memref.load %arg2[%c2_46] : memref<4xf32, #tpu.memory_space<smem>>
    %95 = vector.broadcast %92 : vector<1x8xf32> to vector<8x8xf32>
    %96 = arith.mulf %79, %95 : vector<8x8xf32>
    %cst_47 = arith.constant dense<0.000000e+00> : vector<8xf32>
    %97 = vector.multi_reduction <add>, %96, %cst_47 [1] : vector<8x8xf32> to vector<8xf32>
    %98 = vector.shape_cast %97 : vector<8xf32> to vector<8x1xf32>
    %99 = vector.broadcast %93 : f32 to vector<8x1xf32>
    %100 = arith.addf %98, %99 : vector<8x1xf32>
    %101 = math.tanh %100 : vector<8x1xf32>
    %102 = vector.broadcast %91 : vector<1x8xf32> to vector<8x8xf32>
    %103 = vector.broadcast %101 : vector<8x1xf32> to vector<8x8xf32>
    %104 = arith.mulf %102, %103 : vector<8x8xf32>
    %105 = arith.addf %79, %104 : vector<8x8xf32>
    %106 = arith.mulf %101, %101 : vector<8x1xf32>
    %cst_48 = arith.constant 1.000000e+00 : f32
    %107 = vector.broadcast %cst_48 : f32 to vector<8x1xf32>
    %108 = arith.subf %107, %106 : vector<8x1xf32>
    %109 = vector.broadcast %94 : f32 to vector<8x1xf32>
    %110 = arith.mulf %108, %109 : vector<8x1xf32>
    %cst_49 = arith.constant 1.000000e+00 : f32
    %111 = vector.broadcast %cst_49 : f32 to vector<8x1xf32>
    %112 = arith.addf %111, %110 : vector<8x1xf32>
    %113 = math.absf %112 : vector<8x1xf32>
    %cst_50 = arith.constant 9.99999993E-9 : f32
    %114 = vector.broadcast %cst_50 : f32 to vector<8x1xf32>
    %115 = arith.addf %113, %114 : vector<8x1xf32>
    %116 = arith.mulf %90, %115 : vector<8x1xf32>
    %c3 = arith.constant 3 : index
    %c0_51 = arith.constant 0 : index
    %117 = vector.load %arg11[%c3, %c0_51] : memref<4x8xf32, #tpu.memory_space<vmem>>, vector<1x8xf32>
    %c3_52 = arith.constant 3 : index
    %c0_53 = arith.constant 0 : index
    %118 = vector.load %arg12[%c3_52, %c0_53] : memref<4x8xf32, #tpu.memory_space<vmem>>, vector<1x8xf32>
    %c3_54 = arith.constant 3 : index
    %119 = memref.load %arg1[%c3_54] : memref<4xf32, #tpu.memory_space<smem>>
    %c3_55 = arith.constant 3 : index
    %120 = memref.load %arg2[%c3_55] : memref<4xf32, #tpu.memory_space<smem>>
    %121 = vector.broadcast %118 : vector<1x8xf32> to vector<8x8xf32>
    %122 = arith.mulf %105, %121 : vector<8x8xf32>
    %cst_56 = arith.constant dense<0.000000e+00> : vector<8xf32>
    %123 = vector.multi_reduction <add>, %122, %cst_56 [1] : vector<8x8xf32> to vector<8xf32>
    %124 = vector.shape_cast %123 : vector<8xf32> to vector<8x1xf32>
    %125 = vector.broadcast %119 : f32 to vector<8x1xf32>
    %126 = arith.addf %124, %125 : vector<8x1xf32>
    %127 = math.tanh %126 : vector<8x1xf32>
    %128 = vector.broadcast %117 : vector<1x8xf32> to vector<8x8xf32>
    %129 = vector.broadcast %127 : vector<8x1xf32> to vector<8x8xf32>
    %130 = arith.mulf %128, %129 : vector<8x8xf32>
    %131 = arith.addf %105, %130 : vector<8x8xf32>
    %132 = arith.mulf %127, %127 : vector<8x1xf32>
    %cst_57 = arith.constant 1.000000e+00 : f32
    %133 = vector.broadcast %cst_57 : f32 to vector<8x1xf32>
    %134 = arith.subf %133, %132 : vector<8x1xf32>
    %135 = vector.broadcast %120 : f32 to vector<8x1xf32>
    %136 = arith.mulf %134, %135 : vector<8x1xf32>
    %cst_58 = arith.constant 1.000000e+00 : f32
    %137 = vector.broadcast %cst_58 : f32 to vector<8x1xf32>
    %138 = arith.addf %137, %136 : vector<8x1xf32>
    %139 = math.absf %138 : vector<8x1xf32>
    %cst_59 = arith.constant 9.99999993E-9 : f32
    %140 = vector.broadcast %cst_59 : f32 to vector<8x1xf32>
    %141 = arith.addf %139, %140 : vector<8x1xf32>
    %142 = arith.mulf %116, %141 : vector<8x1xf32>
    %143 = math.log %142 : vector<8x1xf32>
    %144 = arith.subf %37, %143 : vector<8x1xf32>
    %c0_60 = arith.constant 0 : index
    %c0_61 = arith.constant 0 : index
    %145 = vector.load %arg13[%c0_60, %c0_61] : memref<8x128xf32, #tpu.memory_space<vmem>>, vector<8x8xf32>
    tpu.vector_store %arg13[%c0_60, %c0_61], %131 {strides = array<i32>} : memref<8x128xf32, #tpu.memory_space<vmem>>, vector<8x8xf32>,
    %c0_62 = arith.constant 0 : index
    %c8 = arith.constant 8 : index
    %146 = vector.load %arg13[%c0_62, %c8] : memref<8x128xf32, #tpu.memory_space<vmem>>, vector<8x8xf32>
    tpu.vector_store %arg13[%c0_62, %c8], %21 {strides = array<i32>} : memref<8x128xf32, #tpu.memory_space<vmem>>, vector<8x8xf32>,
    %c0_63 = arith.constant 0 : index
    %c16 = arith.constant 16 : index
    %147 = vector.load %arg13[%c0_63, %c16] : memref<8x128xf32, #tpu.memory_space<vmem>>, vector<8x8xf32>
    tpu.vector_store %arg13[%c0_63, %c16], %22 {strides = array<i32>} : memref<8x128xf32, #tpu.memory_space<vmem>>, vector<8x8xf32>,
    %148 = vector.shape_cast %144 : vector<8x1xf32> to vector<8x1xf32>
    %149 = vector.broadcast %148 : vector<8x1xf32> to vector<8x104xf32>
    %c0_64 = arith.constant 0 : index
    %c24 = arith.constant 24 : index
    %150 = vector.load %arg13[%c0_64, %c24] : memref<8x128xf32, #tpu.memory_space<vmem>>, vector<8x104xf32>
    tpu.vector_store %arg13[%c0_64, %c24], %149 {strides = array<i32>} : memref<8x128xf32, #tpu.memory_space<vmem>>, vector<8x104xf32>,
    return
  }
  func.func @transform_0(%arg0: i32, %arg1: memref<4xf32, #tpu.memory_space<smem>>, %arg2: memref<4xf32, #tpu.memory_space<smem>>) -> (i32, i32) {
    %c0_i32 = arith.constant 0 : i32
    %c0_i32_0 = arith.constant 0 : i32
    return %arg0, %c0_i32 : i32, i32
  }
  func.func @transform_1(%arg0: i32, %arg1: memref<4xf32, #tpu.memory_space<smem>>, %arg2: memref<4xf32, #tpu.memory_space<smem>>) -> (i32, i32) {
    %c0_i32 = arith.constant 0 : i32
    %c0_i32_0 = arith.constant 0 : i32
    return %arg0, %c0_i32 : i32, i32
  }
  func.func @transform_2(%arg0: i32, %arg1: memref<4xf32, #tpu.memory_space<smem>>, %arg2: memref<4xf32, #tpu.memory_space<smem>>) -> (i32, i32) {
    %c0_i32 = arith.constant 0 : i32
    %c0_i32_0 = arith.constant 0 : i32
    %c0_i32_1 = arith.constant 0 : i32
    return %c0_i32, %c0_i32_0 : i32, i32
  }
  func.func @transform_3(%arg0: i32, %arg1: memref<4xf32, #tpu.memory_space<smem>>, %arg2: memref<4xf32, #tpu.memory_space<smem>>) -> (i32, i32) {
    %c0_i32 = arith.constant 0 : i32
    %c0_i32_0 = arith.constant 0 : i32
    %c0_i32_1 = arith.constant 0 : i32
    return %c0_i32, %c0_i32_0 : i32, i32
  }
  func.func @transform_4(%arg0: i32, %arg1: memref<4xf32, #tpu.memory_space<smem>>, %arg2: memref<4xf32, #tpu.memory_space<smem>>) -> (i32, i32) {
    %c0_i32 = arith.constant 0 : i32
    %c0_i32_0 = arith.constant 0 : i32
    %c0_i32_1 = arith.constant 0 : i32
    return %c0_i32, %c0_i32_0 : i32, i32
  }
  func.func @transform_5(%arg0: i32, %arg1: memref<4xf32, #tpu.memory_space<smem>>, %arg2: memref<4xf32, #tpu.memory_space<smem>>) -> (i32, i32) {
    %c0_i32 = arith.constant 0 : i32
    %c0_i32_0 = arith.constant 0 : i32
    %c0_i32_1 = arith.constant 0 : i32
    return %c0_i32, %c0_i32_0 : i32, i32
  }
  func.func @transform_6(%arg0: i32, %arg1: memref<4xf32, #tpu.memory_space<smem>>, %arg2: memref<4xf32, #tpu.memory_space<smem>>) -> (i32, i32) {
    %c0_i32 = arith.constant 0 : i32
    %c0_i32_0 = arith.constant 0 : i32
    %c0_i32_1 = arith.constant 0 : i32
    return %c0_i32, %c0_i32_0 : i32, i32
  }
  func.func @transform_7(%arg0: i32, %arg1: memref<4xf32, #tpu.memory_space<smem>>, %arg2: memref<4xf32, #tpu.memory_space<smem>>) -> (i32, i32) {
    %c0_i32 = arith.constant 0 : i32
    %c0_i32_0 = arith.constant 0 : i32
    %c0_i32_1 = arith.constant 0 : i32
    return %c0_i32, %c0_i32_0 : i32, i32
  }
  func.func @transform_8(%arg0: i32, %arg1: memref<4xf32, #tpu.memory_space<smem>>, %arg2: memref<4xf32, #tpu.memory_space<smem>>) -> (i32, i32) {
    %c0_i32 = arith.constant 0 : i32
    %c0_i32_0 = arith.constant 0 : i32
    %c0_i32_1 = arith.constant 0 : i32
    return %c0_i32, %c0_i32_0 : i32, i32
  }
  func.func @transform_9(%arg0: i32, %arg1: memref<4xf32, #tpu.memory_space<smem>>, %arg2: memref<4xf32, #tpu.memory_space<smem>>) -> (i32, i32) {
    %c0_i32 = arith.constant 0 : i32
    %c0_i32_0 = arith.constant 0 : i32
    %c0_i32_1 = arith.constant 0 : i32
    return %c0_i32, %c0_i32_0 : i32, i32
  }
  func.func @transform_10(%arg0: i32, %arg1: memref<4xf32, #tpu.memory_space<smem>>, %arg2: memref<4xf32, #tpu.memory_space<smem>>) -> (i32, i32) {
    %c0_i32 = arith.constant 0 : i32
    %c0_i32_0 = arith.constant 0 : i32
    return %arg0, %c0_i32 : i32, i32
  }
}

</mosaic_0001>

<bundles_post_ra>
// kernel: tpu_custom_call.1
= control target key start
LH: loop header
LB: loop body
LE: loop exit
PB: predicated region body
PF: predicated region fallthrough
CT: control target
= control target key end

     0   :  { %s910_s27 = smov [#allocation3]   ;;  %s911_s28 = smov [#allocation4]   ;;  %s1149_s0 = inlined_call_operand.vmem [shape: f32[4], index: 0, kind: input, shape index: {}]   ;;  %s1150_s2 = inlined_call_operand.vmem [shape: f32[16,8], index: 2, kind: input, shape index: {}]   ;;  %s1151_s3 = inlined_call_operand.vmem [shape: f32[16,8], index: 3, kind: input, shape index: {}]   ;;  %s1152_s4 = inlined_call_operand.vmem [shape: bf16[8,32], index: 4, kind: input, shape index: {}]   ;;  %s1153_s5 = inlined_call_operand.vmem [shape: f32[1,32], index: 5, kind: input, shape index: {}]   ;;  %s1154_s6 = inlined_call_operand.vmem [shape: bf16[32,32], index: 6, kind: input, shape index: {}]   ;;  %s1155_s7 = inlined_call_operand.vmem [shape: f32[1,32], index: 7, kind: input, shape index: {}]   ;;  %s1156_s8 = inlined_call_operand.vmem [shape: bf16[32,16], index: 8, kind: input, shape index: {}]   ;;  %s1157_s9 = inlined_call_operand.vmem [shape: f32[1,16], index: 9, kind: input, shape index: {}]   ;;  %s1158_s10 = inlined_call_operand.vmem [shape: f32[4,8], index: 10, kind: input, shape index: {}]   ;;  %s1159_s11 = inlined_call_operand.vmem [shape: f32[4,8], index: 11, kind: input, shape index: {}]   ;;  %s1160_s12 = inlined_call_operand.hbm [shape: f32[16,128], index: 12, kind: output, shape index: {}]   ;;  %s1161_s1 = inlined_call_operand.vmem [shape: f32[4], index: 1, kind: input, shape index: {}]  }
   0x1   :  { %s18_s23 = sshll.u32 %s1149_s0, 4  ;;  %s23_s26 = sshll.u32 %s1161_s1, 4  ;;  %s19_s23 = int_to_ptr.vmem [resolvable:$true] %s18_s23  ;;  %s24_s26 = int_to_ptr.vmem [resolvable:$true] %s23_s26 }
   0x2   :  { %21 = dma.vmem_to_smem %s19_s23, 16, %s910_s27, [#allocation2] }
   0x3   :  { %26 = dma.vmem_to_smem %s24_s26, 16, %s911_s28, [#allocation2] }
   0x4   :  { %888 = dma.done.wait [#allocation2], 32 }
   0x5   :  { %889 = vsyncadd [#allocation2], 4294967264 }
   0x6   :  { %29 = sfence }
   0x7   :  { %30 = vsyncpa [#allocation6], 0 }
   0x8   :  { %32 = vsyncpa [#allocation6 + $0x1], 0  ;;  %s985_s29 = smov 0   ;;  %s987_s30 = smov 0  }
   0x9   :  { %s989_s0 = smov 0   ;;  %s991_s13 = smov 0  }
   0xa LB: > { %s1006_s1 = sadd.s32 4294967295, %s908_s13   ;;  %s710_s14 = sadd.s32 4294967294, %s908_s13   ;;  %s908_s13 = sphi %s991_s13, %s1167_s13   ;;  %s904_s0 = sphi %s989_s0, %s1166_s0   ;;  %s900_s30 = sphi %s987_s30, %s1165_s30   ;;  %s896_s29 = sphi %s985_s29, %s1164_s29  }
   0xb   : > { %s1010_s15 = sadd.s32 1, %s908_s13   ;;  %s265_s16 = sadd.s32 1, %s904_s0 }
   0xc   : > { %s262_s17 = ssub.s32 %s908_s13, %s1010_s15  ;;  %p275_p0 = scmp.ne.s32.totalorder %s904_s0, %s900_s30 }
   0xd   : > { %p263_p1 = scmp.eq.s32.totalorder %s262_s17, 0  ;;  %p276_p2 = scmp.eq.s32.totalorder %s1006_s1, 1 }
   0xe   : > { %p281_p3 = scmp.ne.s32.totalorder %s900_s30, %s896_s29  ;;  %p282_p4 = scmp.eq.s32.totalorder %s710_s14, 1 }
   0xf   : > { %s1021_s18 = scalar_select %p263_p1, %s904_s0, %s265_s16  }
  0x10   : > { %p1023_p5 = por %p276_p2, %p275_p0  ;;  %p1027_p6 = por %p282_p4, %p281_p3 }
  0x11   : > { %p713_p7 = scmp.ge.s32.totalorder %s908_s13, 1  ;;  %p338_p8 = scmp.lt.s32.totalorder %s908_s13, 3 }
  0x13   : > { %p339_p9 = pnand %p713_p7, %p338_p8 }
  0x14   : > { %p379_p10 = scmp.lt.s32.totalorder (!%p339_p9), %s1006_s1, 1  ;;  %s912_s17 = smov (!%p339_p9), 8  }
  0x15   : > { %342 = sbr.rel (%p339_p9) target bundleno = 1121 (0x461), region = 60  ;;  %s913_s25 = smov (!%p339_p9), 120  }
  0x16   : > { %s520_s28 = sld [smem:[#allocation3]] (!%p339_p9)  ;;  %s376_s14 = sand.u32 (!%p339_p9), 1, %s900_s30  }
  0x17   : > { %s737_s26 = sld [smem:[#allocation4 + $0x1]] (!%p339_p9) }
  0x18   : > { %s738_s21 = sld [smem:[#allocation3 + $0x2]] (!%p339_p9) }
  0x19   : > { %s739_s22 = sld [smem:[#allocation4 + $0x2]] (!%p339_p9) }
  0x1a   : > { %v390_v0 = vld [vmem:[%s1152_s4] sm:$0xf]  ;;  %vm399_vm0 = vcmask 1043456   ;;  %s380_s23 = scalar_select %p379_p10, %s1006_s1, 1  ;;  %vm395_vm1 = vcmask 64512   ;;  %v747_v4 = vld [vmem:[%s1154_s6 + $0x8] sm:$0xff] }
  0x1b   : > { %v401_v1 = vsel %vm399_vm0, %v390_v0, 0  ;;  %448 = vmatpush.bf16.msra.mxu1 %v747_v4  ;;  %v746_v5 = vld [vmem:[%s1154_s6] sm:$0xff]  ;;  %vm438_vm2 = vcmask 261120   ;;  %v749_v12 = vld [vmem:[%s1156_s8 + $0x8] sm:$0xff]  ;;  %vm617_vm3 = vcmask 130112   ;;  %vm619_vm4 = vcmask 195712  }
  0x1c   : > { %410 = vmatpush.bf16.msra.mxu0 %v401_v1  ;;  %s715_s24 = sshll.u32 %s380_s23, 3  ;;  %v793_v6 = vld [vmem:[%s1153_s5] ss:$0 sm:$0xff]  ;;  %486 = vmatpush.bf16.msra.mxu2 %v749_v12  ;;  %v527_v34 = vstv %s520_s28  ;;  %v798_v40 = vld [vmem:[%s1159_s11 + $0x1] ss:$0 sm:$0xff]  ;;  %s736_s23 = sld [smem:[#allocation3 + $0x1]] }
  0x1d   : > { %s382_s27 = scalar_lea.vmem %s1150_s2, %s715_s24  ;;  %v748_v13 = vld [vmem:[%s1156_s8] sm:$0xff]  ;;  %s386_s16 = scalar_lea.vmem %s1151_s3, %s715_s24  ;;  %v557_v56 = vstv %s737_s26  ;;  %vm621_vm5 = vcmask 1047744  }
  0x1e   : > { %v388_v2 = vld [vmem:[%s382_s27] sm:$0xff]  ;;  %s521_s24 = sld [smem:[#allocation4]] }
  0x1f   : > { %v389_v3 = vpack.c.bf16 %v388_v2, %v388_v2  ;;  %449 = vmatpush.bf16.msra.mxu1 %v746_v5  ;;  %v1061_v14 = vld [vmem:[%s386_s16] sm:$0xff]  ;;  %s740_s27 = sld [smem:[#allocation3 + $0x3]]  ;;  %s624_s16 = scalar_lea.sflag [#allocation6], %s376_s14 }
  0x20   : > { %487 = vmatpush.bf16.msra.mxu2 %v748_v13  ;;  %497 = vrot.lane.b32.xlu0 %v1061_v14, %s912_s17  ;;  %v794_v15 = vld [vmem:[%s1155_s7] ss:$0 sm:$0xff]  ;;  %v799_v50 = vld [vmem:[%s1158_s10 + $0x1] ss:$0 sm:$0xff]  ;;  %v800_v55 = vld [vmem:[%s1159_s11 + $0x2] ss:$0 sm:$0xff] }
  0x21   : > { %717 = vmatmul.msk.bf16.vlgmr.msra.gmra.mxu0 %vm395_vm1, %v389_v3  ;;  %v795_v21 = vld [vmem:[%s1157_s9] ss:$0 sm:$0xff]  ;;  %s741_s28 = sld [smem:[#allocation4 + $0x3]] }
  0x22   : > { %v796_v29 = vld [vmem:[%s1159_s11] ss:$0 sm:$0xff]  ;;  %v549_v44 = vstv %s736_s23  ;;  %s743_s23 = sshll.u32 %s1006_s1, 3 }
  0x23   : > { %v797_v37 = vld [vmem:[%s1158_s10] ss:$0 sm:$0xff] }
  0x24   : > { %v535_v49 = vstv %s521_s24  ;;  %s864_s24 = scalar_lea.hbm %s1160_s12, 16 }
  0x92   : > { %v498_v26 = vpop.permute.xlu0 %497 }
  0x9e   : > { %v412_v7 = vpop.f32.mrf.mxu0 }
  0x9f   : > { %v413_v8 = vadd.f32 %v793_v6, %v412_v7  ;;  %v572_v6 = vstv %s738_s21 }
  0xa1   : > { %804 = vtanh.f32 %v413_v8 }
  0xa6   : > { %v414_v9 = vpop.f32.mrf.mxu0 }
  0xa7   : > { %v805_v10 = vpop.eup %804  ;;  %v506_v9 = vmul.f32 %v1061_v14, %v1061_v14 }
  0xa8   : > { %v417_v11 = vpack.c.bf16 %v805_v10, %v805_v10  ;;  %v801_v10 = vld [vmem:[%s1158_s10 + $0x2] ss:$0 sm:$0xff] }
  0xaa   : > { %726 = vmatmul.msk.bf16.vlgmr.msra.gmra.mxu1 %vm438_vm2, %v417_v11 }
 0x127   : > { %v451_v16 = vpop.f32.mrf.mxu1 }
 0x128   : > { %v452_v17 = vadd.f32 %v794_v15, %v451_v16 }
 0x12a   : > { %806 = vtanh.f32 %v452_v17  ;;  %v802_v17 = vld [vmem:[%s1159_s11 + $0x3] ss:$0 sm:$0xff] }
 0x12f   : > { %v453_v18 = vpop.f32.mrf.mxu1 }
 0x130   : > { %v807_v19 = vpop.eup %806  ;;  %v580_v18 = vstv %s739_s22  ;;  %s714_s22 = sshll.u32 %s376_s14, 3 }
 0x131   : > { %v456_v20 = vpack.c.bf16 %v807_v19, %v807_v19 }
 0x133   : > { %735 = vmatmul.msk.bf16.vlgmr.msra.gmra.mxu2 %vm438_vm2, %v456_v20 }
 0x1b6   : > { %v489_v22 = vpop.f32.mrf.mxu2 }
 0x1b7   : > { %v1072_v23 = vadd.f32 %v795_v21, %v489_v22 }
 0x1b9   : > { %v494_v24 = vmul.f32 1.442695, %v1072_v23  ;;  %v507_v5 = vmul.f32 2.0, %v1072_v23 }
 0x1bb   : > { %808 = vpow2.f32 %v494_v24 }
 0x1be   : > { %v491_v25 = vpop.f32.mrf.mxu2 }
 0x1c1   : > { %v809_v27 = vpop.eup %808 }
 0x1c2   : > { %v500_v28 = vmul.f32 %v809_v27, %v498_v26 }
 0x1c4   : > { %502 = vrot.lane.b32.xlu0 %v500_v28, %s913_s25 }
 0x236   : > { %v503_v30 = vpop.permute.xlu0 %502 }
 0x237   : > { %v505_v31 = vadd.f32 %v503_v30, %v1072_v23 }
 0x239   : > { %v523_v32 = vmul.f32 %v796_v29, %v505_v31  ;;  %v595_v29 = vstv %s740_s27 }
 0x23b   : > { %v524_v33 = vsel %vm395_vm1, %v523_v32, 0.0  ;;  %v803_v32 = vld [vmem:[%s1158_s10 + $0x3] ss:$0 sm:$0xff] }
 0x23c   : > { %525 = vadd.xlane.f32.xlu1 %v524_v33 }
 0x2af   : > { %v526_v35 = vpop.xlane.xlu1 %525 }
 0x2b0   : > { %v528_v36 = vadd.f32 %v527_v34, %v526_v35 }
 0x2b2   : > { %810 = vtanh.f32 %v528_v36 }
 0x2b8   : > { %v811_v38 = vpop.eup %810 }
 0x2b9   : > { %v531_v39 = vmul.f32 %v811_v38, %v797_v37  ;;  %v533_v45 = vmul.f32 %v811_v38, %v811_v38  ;;  %v603_v37 = vstv %s741_s28 }
 0x2bb   : > { %v532_v41 = vadd.f32 %v531_v39, %v505_v31  ;;  %v534_v48 = vsub.f32 1.0, %v533_v45 }
 0x2bd   : > { %v545_v42 = vmul.f32 %v798_v40, %v532_v41  ;;  %v536_v51 = vmul.f32 %v535_v49, %v534_v48 }
 0x2bf   : > { %v546_v43 = vsel %vm395_vm1, %v545_v42, 0.0  ;;  %v537_v57 = vadd.f32 1.0, %v536_v51 }
 0x2c0   : > { %547 = vadd.xlane.f32.xlu1 %v546_v43 }
 0x2c1   : > { %v538_v62 = vand.u32 2147483647, %v537_v57 }
 0x2c3   : > { %v539_v2 = vadd.f32 1e-08, %v538_v62 }
 0x333   : > { %v548_v46 = vpop.xlane.xlu1 %547 }
 0x334   : > { %v550_v47 = vadd.f32 %v549_v44, %v548_v46 }
 0x336   : > { %812 = vtanh.f32 %v550_v47 }
 0x33c   : > { %v813_v52 = vpop.eup %812 }
 0x33d   : > { %v555_v53 = vmul.f32 %v813_v52, %v813_v52  ;;  %v553_v54 = vmul.f32 %v813_v52, %v799_v50 }
 0x33f   : > { %v556_v58 = vsub.f32 1.0, %v555_v53  ;;  %v554_v59 = vadd.f32 %v553_v54, %v532_v41 }
 0x341   : > { %v558_v60 = vmul.f32 %v557_v56, %v556_v58  ;;  %v568_v61 = vmul.f32 %v800_v55, %v554_v59 }
 0x343   : > { %v559_v63 = vadd.f32 1.0, %v558_v60  ;;  %v569_v0 = vsel %vm395_vm1, %v568_v61, 0.0 }
 0x344   : > { %570 = vadd.xlane.f32.xlu2 %v569_v0 }
 0x345   : > { %v560_v1 = vand.u32 2147483647, %v559_v63 }
 0x347   : > { %v561_v3 = vadd.f32 1e-08, %v560_v1 }
 0x349   : > { %v562_v4 = vmul.f32 %v561_v3, %v539_v2 }
 0x35c   : > { %509 = vrot.lane.b32.xlu2 %v507_v5, %s913_s25  ;;  %s634_s25 = scalar_lea.hbm %s1160_s12, %s743_s23 }
 0x35d   : > { %s638_s28 = sshll.u32 %s634_s25, 4  ;;  %s639_s28 = int_to_ptr.hbm [resolvable:$true] %s638_s28 }
 0x35e   : > { %s858_s21 = sshra.s32 %s639_s28, 4  ;;  %s859_s21 = int_to_ptr.hbm [resolvable:$true] %s858_s21 }
 0x35f   : > { %s860_s1 = scalar_lea.hbm %s859_s21, 8  ;;  %p865_p0 = scmp.lt.s32.totalorder %s859_s21, %s1160_s12 }
 0x360   : > { %p861_p11 = scmp.ne.s32.totalorder %s859_s21, %s860_s1  ;;  %p866_p1 = scmp.lt.s32.totalorder %s864_s24, %s860_s1 }
 0x362   : > { %p862_p12 = pnand %p861_p11, %p1023_p5  ;;  %p867_p2 = por %p866_p1, %p865_p0 }
 0x364   : > { %p863_p13 = pneg %p862_p12 }
 0x366   : > { %p868_p3 = pnand %p867_p2, %p863_p13 }
 0x3b7   : > { %v571_v7 = vpop.xlane.xlu2 %570 }
 0x3b8   : > { %v573_v8 = vadd.f32 %v572_v6, %v571_v7 }
 0x3ba   : > { %814 = vtanh.f32 %v573_v8 }
 0x3bf   : > { %v510_v11 = vpop.permute.xlu2 %509 }
 0x3c0   : > { %v815_v12 = vpop.eup %814  ;;  %v512_v13 = vadd.f32 %v510_v11, %v506_v9 }
 0x3c1   : > { %v578_v15 = vmul.f32 %v815_v12, %v815_v12  ;;  %v576_v16 = vmul.f32 %v815_v12, %v801_v10 }
 0x3c2   : > { %v513_v19 = vsel %vm395_vm1, %v512_v13, 0.0 }
 0x3c3   : > { %v579_v20 = vsub.f32 1.0, %v578_v15  ;;  %514 = vadd.xlane.f32.xlu1 %v513_v19  ;;  %v577_v21 = vadd.f32 %v576_v16, %v554_v59 }
 0x3c5   : > { %v581_v14 = vmul.f32 %v580_v18, %v579_v20  ;;  %v591_v22 = vmul.f32 %v802_v17, %v577_v21 }
 0x3c7   : > { %v582_v24 = vadd.f32 1.0, %v581_v14  ;;  %v592_v25 = vsel %vm395_vm1, %v591_v22, 0.0 }
 0x3c8   : > { %593 = vadd.xlane.f32.xlu0 %v592_v25 }
 0x3c9   : > { %v583_v26 = vand.u32 2147483647, %v582_v24 }
 0x3cb   : > { %v584_v27 = vadd.f32 1e-08, %v583_v26 }
 0x3cd   : > { %v585_v28 = vmul.f32 %v584_v27, %v562_v4 }
 0x3dc   : > { %614 = vrot.lane.b32.xlu1 %v1072_v23, %s912_s17  ;;  %s378_s17 = scalar_lea.vmem [#allocation5], %s714_s22 }
 0x3dd   : > { %s636_s27 = sshll.u32 %s378_s17, 4  ;;  %s637_s27 = int_to_ptr.vmem [resolvable:$true] %s636_s27 }
 0x436   : > { %v515_v36 = vpop.xlane.xlu1 %514 }
 0x437   : > { %v516_v45 = vadd.f32 14.703016, %v515_v36 }
 0x439   : > { %v517_v47 = vmul.f32 -0.5, %v516_v45 }
 0x43b   : > { %v594_v30 = vpop.xlane.xlu0 %593 }
 0x43c   : > { %v596_v31 = vadd.f32 %v595_v29, %v594_v30 }
 0x43e   : > { %816 = vtanh.f32 %v596_v31 }
 0x444   : > { %v817_v33 = vpop.eup %816 }
 0x445   : > { %v599_v34 = vmul.f32 %v817_v33, %v803_v32  ;;  %v601_v35 = vmul.f32 %v817_v33, %v817_v33 }
 0x447   : > { %v600_v23 = vadd.f32 %v599_v34, %v577_v21  ;;  %v602_v38 = vsub.f32 1.0, %v601_v35 }
 0x449   : > { %v604_v39 = vmul.f32 %v603_v37, %v602_v38  ;;  %612 = vst.msk [vmem:[%s378_s17] sm:$0xff] %vm395_vm1, %v600_v23 }
 0x44b   : > { %v605_v40 = vadd.f32 1.0, %v604_v39 }
 0x44d   : > { %v606_v41 = vand.u32 2147483647, %v605_v40 }
 0x44e   : > { %v615_v42 = vpop.permute.xlu1 %614 }
 0x44f   : > { %v607_v43 = vadd.f32 1e-08, %v606_v41  ;;  %618 = vst.msk [vmem:[%s378_s17] sm:$0xff] %vm617_vm3, %v615_v42 }
 0x450   : > { %620 = vst.msk [vmem:[%s378_s17] sm:$0xff] %vm619_vm4, %v615_v42 }
 0x451   : > { %v608_v44 = vmul.f32 %v607_v43, %v585_v28 }
 0x453   : > { %818 = vlog2.f32 %v608_v44 }
 0x459   : > { %v819_v46 = vpop.eup %818 }
 0x45a   : > { %v610_v48 = vmul.f32 0.6931472, %v819_v46 }
 0x45c   : > { %v611_v49 = vsub.f32 %v517_v47, %v610_v48 }
 0x45e   : > { %622 = vst.msk [vmem:[%s378_s17] sm:$0xff] %vm621_vm5, %v611_v49 }
 0x45f   : > { %871 = shalt.err (!%p868_p3)
}
 0x460   : > { %750 = dma.vmem_to_hbm [thread:$0]  (%p1023_p5), %s637_s27, 128, %s639_s28, %s624_s16  }
 0x461 PF: > { %p756_p4 = scmp.ge.s32.totalorder %s908_s13, 2  ;;  %s650_s14 = sand.u32 1, %s896_s29  }
 0x462   : > { %s651_s17 = scalar_lea.sflag [#allocation6], %s650_s14 }
 0x463   : > { %p753_p7 = pnand %p756_p4, %p1027_p6 }
 0x465   : > { %p754_p8 = pneg %p753_p7 }
 0x467   : > { %891 = dma.done.wait (%p754_p8), %s651_s17, 128  }
 0x468   : > { %893 = vsyncadd (%p754_p8), %s651_s17, 4294967168  ;;  %p35_p9 = scmp.ge.s32.totalorder %s1010_s15, 4   ;;  %s1164_s29 = smov %s900_s30 }
 0x469   : > { %s1165_s30 = smov %s904_s0  ;;  %s1166_s0 = smov %s1021_s18 }
 0x46a   : > { %s1167_s13 = smov %s1010_s15  ;;  %37 = sbr.rel (!%p35_p9) target bundleno = 10 (0xa), region = 98 }
 0x46f   :  { %657 = vsyncpa [#allocation6], 1 }
 0x470   :  { %659 = vsyncpa [#allocation6 + $0x1], 1 }

</bundles_post_ra>
